<compile_context>
chip_gen: v7x
topology: tpu7x:2x2x1
jax: 0.10.0
libtpu: 0.0.40
codegen_flags: <defaults>
</compile_context>

<pallas_src>
import functools

import numpy as np
import jax
import jax.numpy as jnp
from jax.experimental import pallas as pl
from jax.experimental.pallas import tpu as pltpu


# ------------------------------- Pallas kernel -------------------------------

def _inv_pixel_shuffle_kernel(x_ref, lsel_ref, ssel_ref, o_ref, *, ratio, ho, wo):
    """One grid step: G channel maps [H, W] -> [r*r*ho, wo] each.

    lsel[ry*ho + oy, oy*r + ry] = 1   -> row gather  (oy*r+ry) -> (ry, oy)
    ssel[rx, ox*r + rx, ox]     = 1   -> lane de-interleave for a fixed rx
    Both are 0/1 bf16 matrices, so the MXU matmuls are exact pass-throughs.
    """
    G, H, W = x_ref.shape
    r = ratio
    lsel = lsel_ref[...]                           # [H, H] bf16

    for g in range(G):                             # G is small (<= 8), static unroll
        xg = x_ref[g]                              # [H, W]

        if x_ref.dtype == jnp.bfloat16:
            parts = (xg,)
        else:
            # Split f32 data into three bf16-exact addends so the bf16 MXU path
            # reproduces the f32 values (to < 1e-7 relative) while running at
            # full rate on v5e/v6e/v7x.
            xf = xg.astype(jnp.float32)
            p0 = xf.astype(jnp.bfloat16)
            rem = xf - p0.astype(jnp.float32)
            p1 = rem.astype(jnp.bfloat16)
            p2 = (rem - p1.astype(jnp.float32)).astype(jnp.bfloat16)
            parts = (p0, p1, p2)

        # Row gather: rows (oy*r + ry) -> (ry*ho + oy); keep the bf16 parts apart.
        xp = [jnp.dot(lsel, p, preferred_element_type=jnp.float32).astype(jnp.bfloat16)
              for p in parts]

        for rx in range(r):
            srx = ssel_ref[rx]                     # [W, wo] bf16
            t = jnp.dot(xp[0], srx, preferred_element_type=jnp.float32)
            for p in xp[1:]:
                t = t + jnp.dot(p, srx, preferred_element_type=jnp.float32)
            # t rows are (ry, oy); scatter the r row-blocks to output channels
            # co = ry*r + rx (contiguous sublane stores, full-lane width wo).
            for ry in range(r):
                dst = (ry * r + rx) * ho
                o_ref[g, dst:dst + ho, :] = t[ry * ho:(ry + 1) * ho, :].astype(o_ref.dtype)


# ------------------------------ pallas_call wrapper ---------------------------

def _pick_group_size(n_maps, map_bytes, max_group=8, vmem_budget=2 << 20):
    """Largest channel-group size that divides n_maps, fits the VMEM budget and
    (when possible) still leaves >= 2 grid steps for megacore parallelism."""
    divisors = [g for g in range(1, min(n_maps, max_group) + 1)
                if n_maps % g == 0 and g * map_bytes <= vmem_budget]
    if not divisors:
        return 1
    multi = [g for g in divisors if n_maps // g >= 2]
    return max(multi) if multi else max(divisors)


def inv_pixel_shuffle(x, ratio=2):
    """invPixelShuffle forward.  x: [B, C, H, W] -> [B, C*ratio**2, H//ratio, W//ratio]."""
    B, C, H, W = x.shape
    assert H % ratio == 0 and W % ratio == 0, f'x, y, ratio : {W}, {H}, {ratio}'
    ho, wo = H // ratio, W // ratio
    n = B * C

    # 0/1 selection matrices (exactly representable in bf16).
    ry_g, oy_g = np.meshgrid(np.arange(ratio), np.arange(ho), indexing='ij')
    lsel = np.zeros((H, H), np.float32)
    lsel[ry_g * ho + oy_g, oy_g * ratio + ry_g] = 1.0

    rx_g, ox_g = np.meshgrid(np.arange(ratio), np.arange(wo), indexing='ij')
    ssel = np.zeros((ratio, W, wo), np.float32)
    ssel[rx_g, ox_g * ratio + rx_g, ox_g] = 1.0

    # Per-channel block bytes (input + output are the same size: a permutation).
    map_bytes = 2 * H * W * x.dtype.itemsize
    G = _pick_group_size(n, map_bytes)
    grid = (n // G,)

    kernel = functools.partial(_inv_pixel_shuffle_kernel, ratio=ratio, ho=ho, wo=wo)
    out = pl.pallas_call(
        kernel,
        out_shape=jax.ShapeDtypeStruct((n, ratio * ratio * ho, wo), x.dtype),
        grid_spec=pltpu.PrefetchScalarGridSpec(
            num_scalar_prefetch=0,
            grid=grid,
            in_specs=[
                pl.BlockSpec((G, H, W), lambda i: (i, 0, 0)),
                pl.BlockSpec((H, H), lambda i: (0, 0)),            # resident, not re-DMAed
                pl.BlockSpec((ratio, W, wo), lambda i: (0, 0, 0)),  # resident, not re-DMAed
            ],
            out_specs=pl.BlockSpec((G, ratio * ratio * ho, wo), lambda i: (i, 0, 0)),
        ),
        compiler_params=pltpu.CompilerParams(dimension_semantics=("parallel",)),
    )(x.reshape(n, H, W),
      jnp.asarray(lsel, jnp.bfloat16),
      jnp.asarray(ssel, jnp.bfloat16))

    # Free (contiguous) view back to NCHW output layout.
    return out.reshape(B, C * ratio * ratio, ho, wo)


# ------------------------------- reference & demo -----------------------------

def inv_pixel_shuffle_reference(x, ratio=2):
    B, C, H, W = x.shape
    xr = x.reshape(B, C, H // ratio, ratio, W // ratio, ratio)
    return xr.transpose(0, 1, 3, 5, 2, 4).reshape(
        B, C * ratio * ratio, H // ratio, W // ratio)


if __name__ == "__main__":
    key = jax.random.PRNGKey(0)
    B, C, H, W = 2, 4, 16, 16
    ratio = 2

    x = jax.random.normal(key, (B, C, H, W), jnp.float32)

    y = inv_pixel_shuffle(x, ratio=ratio)
    jax.block_until_ready(y)

    ref = inv_pixel_shuffle_reference(x, ratio=ratio)
    assert y.shape == (B, C * ratio * ratio, H // ratio, W // ratio), y.shape
    assert y.dtype == x.dtype
    np.testing.assert_allclose(np.asarray(y), np.asarray(ref), rtol=1e-6, atol=1e-6)

    print("KERNEL_OK")
</pallas_src>

<mosaic_0001>
module attributes {stable_mosaic.version = 11 : i64} {
  func.func @_inv_pixel_shuffle_kernel(%arg0: i32, %arg1: memref<4x16x16xf32, #tpu.memory_space<vmem>>, %arg2: memref<16x16xbf16, #tpu.memory_space<vmem>>, %arg3: memref<2x16x8xbf16, #tpu.memory_space<vmem>>, %arg4: memref<4x32x8xf32, #tpu.memory_space<vmem>>) attributes {dimension_semantics = [#tpu.dimension_semantics<parallel>], iteration_bounds = array<i64: 2>, scalar_prefetch = 0 : i64, scratch_operands = 0 : i64, tpu.core_type = #tpu.core_type<tc>, window_params = [{transform_indices = @transform_0, window_bounds = array<i64: 4, 16, 16>}, {pipeline_mode = #tpu.pipeline_mode<synchronous>, transform_indices = @transform_1, window_bounds = array<i64: 16, 16>}, {pipeline_mode = #tpu.pipeline_mode<synchronous>, transform_indices = @transform_2, window_bounds = array<i64: 2, 16, 8>}, {transform_indices = @transform_3, window_bounds = array<i64: 4, 32, 8>}]} {
    %c0 = arith.constant 0 : index
    %c0_0 = arith.constant 0 : index
    %0 = vector.load %arg2[%c0, %c0_0] : memref<16x16xbf16, #tpu.memory_space<vmem>>, vector<16x16xbf16>
    %c0_1 = arith.constant 0 : index
    %c0_2 = arith.constant 0 : index
    %c0_3 = arith.constant 0 : index
    %1 = vector.load %arg1[%c0_1, %c0_2, %c0_3] : memref<4x16x16xf32, #tpu.memory_space<vmem>>, vector<1x16x16xf32>
    %2 = vector.shape_cast %1 : vector<1x16x16xf32> to vector<16x16xf32>
    %3 = arith.truncf %2 : vector<16x16xf32> to vector<16x16xbf16>
    %4 = arith.extf %3 : vector<16x16xbf16> to vector<16x16xf32>
    %5 = arith.subf %2, %4 : vector<16x16xf32>
    %6 = arith.truncf %5 : vector<16x16xf32> to vector<16x16xbf16>
    %7 = arith.extf %6 : vector<16x16xbf16> to vector<16x16xf32>
    %8 = arith.subf %5, %7 : vector<16x16xf32>
    %9 = arith.truncf %8 : vector<16x16xf32> to vector<16x16xbf16>
    %cst = arith.constant dense<0.000000e+00> : vector<16x16xf32>
    %10 = tpu.matmul %0, %3, %cst {dimension_numbers = #tpu.dot_dimension_numbers<[1], [0], [0], [1], [0, 0, 1, 1], [], []>} : vector<16x16xbf16>, vector<16x16xbf16>, vector<16x16xf32> -> vector<16x16xf32>
    %11 = arith.truncf %10 : vector<16x16xf32> to vector<16x16xbf16>
    %cst_4 = arith.constant dense<0.000000e+00> : vector<16x16xf32>
    %12 = tpu.matmul %0, %6, %cst_4 {dimension_numbers = #tpu.dot_dimension_numbers<[1], [0], [0], [1], [0, 0, 1, 1], [], []>} : vector<16x16xbf16>, vector<16x16xbf16>, vector<16x16xf32> -> vector<16x16xf32>
    %13 = arith.truncf %12 : vector<16x16xf32> to vector<16x16xbf16>
    %cst_5 = arith.constant dense<0.000000e+00> : vector<16x16xf32>
    %14 = tpu.matmul %0, %9, %cst_5 {dimension_numbers = #tpu.dot_dimension_numbers<[1], [0], [0], [1], [0, 0, 1, 1], [], []>} : vector<16x16xbf16>, vector<16x16xbf16>, vector<16x16xf32> -> vector<16x16xf32>
    %15 = arith.truncf %14 : vector<16x16xf32> to vector<16x16xbf16>
    %c0_6 = arith.constant 0 : index
    %c0_7 = arith.constant 0 : index
    %c0_8 = arith.constant 0 : index
    %16 = vector.load %arg3[%c0_6, %c0_7, %c0_8] : memref<2x16x8xbf16, #tpu.memory_space<vmem>>, vector<1x16x8xbf16>
    %17 = vector.shape_cast %16 : vector<1x16x8xbf16> to vector<16x8xbf16>
    %cst_9 = arith.constant dense<0.000000e+00> : vector<16x8xf32>
    %18 = tpu.matmul %11, %17, %cst_9 {dimension_numbers = #tpu.dot_dimension_numbers<[1], [0], [0], [1], [0, 0, 1, 1], [], []>} : vector<16x16xbf16>, vector<16x8xbf16>, vector<16x8xf32> -> vector<16x8xf32>
    %cst_10 = arith.constant dense<0.000000e+00> : vector<16x8xf32>
    %19 = tpu.matmul %13, %17, %cst_10 {dimension_numbers = #tpu.dot_dimension_numbers<[1], [0], [0], [1], [0, 0, 1, 1], [], []>} : vector<16x16xbf16>, vector<16x8xbf16>, vector<16x8xf32> -> vector<16x8xf32>
    %20 = arith.addf %18, %19 : vector<16x8xf32>
    %cst_11 = arith.constant dense<0.000000e+00> : vector<16x8xf32>
    %21 = tpu.matmul %15, %17, %cst_11 {dimension_numbers = #tpu.dot_dimension_numbers<[1], [0], [0], [1], [0, 0, 1, 1], [], []>} : vector<16x16xbf16>, vector<16x8xbf16>, vector<16x8xf32> -> vector<16x8xf32>
    %22 = arith.addf %20, %21 : vector<16x8xf32>
    %23 = vector.extract_strided_slice %22 {offsets = [0, 0], sizes = [8, 8], strides = [1, 1]} : vector<16x8xf32> to vector<8x8xf32>
    %c0_12 = arith.constant 0 : index
    %c0_13 = arith.constant 0 : index
    %c0_14 = arith.constant 0 : index
    %24 = vector.load %arg4[%c0_12, %c0_13, %c0_14] : memref<4x32x8xf32, #tpu.memory_space<vmem>>, vector<1x8x8xf32>
    %25 = vector.shape_cast %24 : vector<1x8x8xf32> to vector<8x8xf32>
    %26 = vector.shape_cast %23 : vector<8x8xf32> to vector<1x8x8xf32>
    tpu.vector_store %arg4[%c0_12, %c0_13, %c0_14], %26 {strides = array<i32>} : memref<4x32x8xf32, #tpu.memory_space<vmem>>, vector<1x8x8xf32>,
    %27 = vector.extract_strided_slice %22 {offsets = [8, 0], sizes = [8, 8], strides = [1, 1]} : vector<16x8xf32> to vector<8x8xf32>
    %c0_15 = arith.constant 0 : index
    %c16 = arith.constant 16 : index
    %c0_16 = arith.constant 0 : index
    %28 = vector.load %arg4[%c0_15, %c16, %c0_16] : memref<4x32x8xf32, #tpu.memory_space<vmem>>, vector<1x8x8xf32>
    %29 = vector.shape_cast %28 : vector<1x8x8xf32> to vector<8x8xf32>
    %30 = vector.shape_cast %27 : vector<8x8xf32> to vector<1x8x8xf32>
    tpu.vector_store %arg4[%c0_15, %c16, %c0_16], %30 {strides = array<i32>} : memref<4x32x8xf32, #tpu.memory_space<vmem>>, vector<1x8x8xf32>,
    %c1 = arith.constant 1 : index
    %c0_17 = arith.constant 0 : index
    %c0_18 = arith.constant 0 : index
    %31 = vector.load %arg3[%c1, %c0_17, %c0_18] : memref<2x16x8xbf16, #tpu.memory_space<vmem>>, vector<1x16x8xbf16>
    %32 = vector.shape_cast %31 : vector<1x16x8xbf16> to vector<16x8xbf16>
    %cst_19 = arith.constant dense<0.000000e+00> : vector<16x8xf32>
    %33 = tpu.matmul %11, %32, %cst_19 {dimension_numbers = #tpu.dot_dimension_numbers<[1], [0], [0], [1], [0, 0, 1, 1], [], []>} : vector<16x16xbf16>, vector<16x8xbf16>, vector<16x8xf32> -> vector<16x8xf32>
    %cst_20 = arith.constant dense<0.000000e+00> : vector<16x8xf32>
    %34 = tpu.matmul %13, %32, %cst_20 {dimension_numbers = #tpu.dot_dimension_numbers<[1], [0], [0], [1], [0, 0, 1, 1], [], []>} : vector<16x16xbf16>, vector<16x8xbf16>, vector<16x8xf32> -> vector<16x8xf32>
    %35 = arith.addf %33, %34 : vector<16x8xf32>
    %cst_21 = arith.constant dense<0.000000e+00> : vector<16x8xf32>
    %36 = tpu.matmul %15, %32, %cst_21 {dimension_numbers = #tpu.dot_dimension_numbers<[1], [0], [0], [1], [0, 0, 1, 1], [], []>} : vector<16x16xbf16>, vector<16x8xbf16>, vector<16x8xf32> -> vector<16x8xf32>
    %37 = arith.addf %35, %36 : vector<16x8xf32>
    %38 = vector.extract_strided_slice %37 {offsets = [0, 0], sizes = [8, 8], strides = [1, 1]} : vector<16x8xf32> to vector<8x8xf32>
    %c0_22 = arith.constant 0 : index
    %c8 = arith.constant 8 : index
    %c0_23 = arith.constant 0 : index
    %39 = vector.load %arg4[%c0_22, %c8, %c0_23] : memref<4x32x8xf32, #tpu.memory_space<vmem>>, vector<1x8x8xf32>
    %40 = vector.shape_cast %39 : vector<1x8x8xf32> to vector<8x8xf32>
    %41 = vector.shape_cast %38 : vector<8x8xf32> to vector<1x8x8xf32>
    tpu.vector_store %arg4[%c0_22, %c8, %c0_23], %41 {strides = array<i32>} : memref<4x32x8xf32, #tpu.memory_space<vmem>>, vector<1x8x8xf32>,
    %42 = vector.extract_strided_slice %37 {offsets = [8, 0], sizes = [8, 8], strides = [1, 1]} : vector<16x8xf32> to vector<8x8xf32>
    %c0_24 = arith.constant 0 : index
    %c24 = arith.constant 24 : index
    %c0_25 = arith.constant 0 : index
    %43 = vector.load %arg4[%c0_24, %c24, %c0_25] : memref<4x32x8xf32, #tpu.memory_space<vmem>>, vector<1x8x8xf32>
    %44 = vector.shape_cast %43 : vector<1x8x8xf32> to vector<8x8xf32>
    %45 = vector.shape_cast %42 : vector<8x8xf32> to vector<1x8x8xf32>
    tpu.vector_store %arg4[%c0_24, %c24, %c0_25], %45 {strides = array<i32>} : memref<4x32x8xf32, #tpu.memory_space<vmem>>, vector<1x8x8xf32>,
    %c1_26 = arith.constant 1 : index
    %c0_27 = arith.constant 0 : index
    %c0_28 = arith.constant 0 : index
    %46 = vector.load %arg1[%c1_26, %c0_27, %c0_28] : memref<4x16x16xf32, #tpu.memory_space<vmem>>, vector<1x16x16xf32>
    %47 = vector.shape_cast %46 : vector<1x16x16xf32> to vector<16x16xf32>
    %48 = arith.truncf %47 : vector<16x16xf32> to vector<16x16xbf16>
    %49 = arith.extf %48 : vector<16x16xbf16> to vector<16x16xf32>
    %50 = arith.subf %47, %49 : vector<16x16xf32>
    %51 = arith.truncf %50 : vector<16x16xf32> to vector<16x16xbf16>
    %52 = arith.extf %51 : vector<16x16xbf16> to vector<16x16xf32>
    %53 = arith.subf %50, %52 : vector<16x16xf32>
    %54 = arith.truncf %53 : vector<16x16xf32> to vector<16x16xbf16>
    %cst_29 = arith.constant dense<0.000000e+00> : vector<16x16xf32>
    %55 = tpu.matmul %0, %48, %cst_29 {dimension_numbers = #tpu.dot_dimension_numbers<[1], [0], [0], [1], [0, 0, 1, 1], [], []>} : vector<16x16xbf16>, vector<16x16xbf16>, vector<16x16xf32> -> vector<16x16xf32>
    %56 = arith.truncf %55 : vector<16x16xf32> to vector<16x16xbf16>
    %cst_30 = arith.constant dense<0.000000e+00> : vector<16x16xf32>
    %57 = tpu.matmul %0, %51, %cst_30 {dimension_numbers = #tpu.dot_dimension_numbers<[1], [0], [0], [1], [0, 0, 1, 1], [], []>} : vector<16x16xbf16>, vector<16x16xbf16>, vector<16x16xf32> -> vector<16x16xf32>
    %58 = arith.truncf %57 : vector<16x16xf32> to vector<16x16xbf16>
    %cst_31 = arith.constant dense<0.000000e+00> : vector<16x16xf32>
    %59 = tpu.matmul %0, %54, %cst_31 {dimension_numbers = #tpu.dot_dimension_numbers<[1], [0], [0], [1], [0, 0, 1, 1], [], []>} : vector<16x16xbf16>, vector<16x16xbf16>, vector<16x16xf32> -> vector<16x16xf32>
    %60 = arith.truncf %59 : vector<16x16xf32> to vector<16x16xbf16>
    %c0_32 = arith.constant 0 : index
    %c0_33 = arith.constant 0 : index
    %c0_34 = arith.constant 0 : index
    %61 = vector.load %arg3[%c0_32, %c0_33, %c0_34] : memref<2x16x8xbf16, #tpu.memory_space<vmem>>, vector<1x16x8xbf16>
    %62 = vector.shape_cast %61 : vector<1x16x8xbf16> to vector<16x8xbf16>
    %cst_35 = arith.constant dense<0.000000e+00> : vector<16x8xf32>
    %63 = tpu.matmul %56, %62, %cst_35 {dimension_numbers = #tpu.dot_dimension_numbers<[1], [0], [0], [1], [0, 0, 1, 1], [], []>} : vector<16x16xbf16>, vector<16x8xbf16>, vector<16x8xf32> -> vector<16x8xf32>
    %cst_36 = arith.constant dense<0.000000e+00> : vector<16x8xf32>
    %64 = tpu.matmul %58, %62, %cst_36 {dimension_numbers = #tpu.dot_dimension_numbers<[1], [0], [0], [1], [0, 0, 1, 1], [], []>} : vector<16x16xbf16>, vector<16x8xbf16>, vector<16x8xf32> -> vector<16x8xf32>
    %65 = arith.addf %63, %64 : vector<16x8xf32>
    %cst_37 = arith.constant dense<0.000000e+00> : vector<16x8xf32>
    %66 = tpu.matmul %60, %62, %cst_37 {dimension_numbers = #tpu.dot_dimension_numbers<[1], [0], [0], [1], [0, 0, 1, 1], [], []>} : vector<16x16xbf16>, vector<16x8xbf16>, vector<16x8xf32> -> vector<16x8xf32>
    %67 = arith.addf %65, %66 : vector<16x8xf32>
    %68 = vector.extract_strided_slice %67 {offsets = [0, 0], sizes = [8, 8], strides = [1, 1]} : vector<16x8xf32> to vector<8x8xf32>
    %c1_38 = arith.constant 1 : index
    %c0_39 = arith.constant 0 : index
    %c0_40 = arith.constant 0 : index
    %69 = vector.load %arg4[%c1_38, %c0_39, %c0_40] : memref<4x32x8xf32, #tpu.memory_space<vmem>>, vector<1x8x8xf32>
    %70 = vector.shape_cast %69 : vector<1x8x8xf32> to vector<8x8xf32>
    %71 = vector.shape_cast %68 : vector<8x8xf32> to vector<1x8x8xf32>
    tpu.vector_store %arg4[%c1_38, %c0_39, %c0_40], %71 {strides = array<i32>} : memref<4x32x8xf32, #tpu.memory_space<vmem>>, vector<1x8x8xf32>,
    %72 = vector.extract_strided_slice %67 {offsets = [8, 0], sizes = [8, 8], strides = [1, 1]} : vector<16x8xf32> to vector<8x8xf32>
    %c1_41 = arith.constant 1 : index
    %c16_42 = arith.constant 16 : index
    %c0_43 = arith.constant 0 : index
    %73 = vector.load %arg4[%c1_41, %c16_42, %c0_43] : memref<4x32x8xf32, #tpu.memory_space<vmem>>, vector<1x8x8xf32>
    %74 = vector.shape_cast %73 : vector<1x8x8xf32> to vector<8x8xf32>
    %75 = vector.shape_cast %72 : vector<8x8xf32> to vector<1x8x8xf32>
    tpu.vector_store %arg4[%c1_41, %c16_42, %c0_43], %75 {strides = array<i32>} : memref<4x32x8xf32, #tpu.memory_space<vmem>>, vector<1x8x8xf32>,
    %c1_44 = arith.constant 1 : index
    %c0_45 = arith.constant 0 : index
    %c0_46 = arith.constant 0 : index
    %76 = vector.load %arg3[%c1_44, %c0_45, %c0_46] : memref<2x16x8xbf16, #tpu.memory_space<vmem>>, vector<1x16x8xbf16>
    %77 = vector.shape_cast %76 : vector<1x16x8xbf16> to vector<16x8xbf16>
    %cst_47 = arith.constant dense<0.000000e+00> : vector<16x8xf32>
    %78 = tpu.matmul %56, %77, %cst_47 {dimension_numbers = #tpu.dot_dimension_numbers<[1], [0], [0], [1], [0, 0, 1, 1], [], []>} : vector<16x16xbf16>, vector<16x8xbf16>, vector<16x8xf32> -> vector<16x8xf32>
    %cst_48 = arith.constant dense<0.000000e+00> : vector<16x8xf32>
    %79 = tpu.matmul %58, %77, %cst_48 {dimension_numbers = #tpu.dot_dimension_numbers<[1], [0], [0], [1], [0, 0, 1, 1], [], []>} : vector<16x16xbf16>, vector<16x8xbf16>, vector<16x8xf32> -> vector<16x8xf32>
    %80 = arith.addf %78, %79 : vector<16x8xf32>
    %cst_49 = arith.constant dense<0.000000e+00> : vector<16x8xf32>
    %81 = tpu.matmul %60, %77, %cst_49 {dimension_numbers = #tpu.dot_dimension_numbers<[1], [0], [0], [1], [0, 0, 1, 1], [], []>} : vector<16x16xbf16>, vector<16x8xbf16>, vector<16x8xf32> -> vector<16x8xf32>
    %82 = arith.addf %80, %81 : vector<16x8xf32>
    %83 = vector.extract_strided_slice %82 {offsets = [0, 0], sizes = [8, 8], strides = [1, 1]} : vector<16x8xf32> to vector<8x8xf32>
    %c1_50 = arith.constant 1 : index
    %c8_51 = arith.constant 8 : index
    %c0_52 = arith.constant 0 : index
    %84 = vector.load %arg4[%c1_50, %c8_51, %c0_52] : memref<4x32x8xf32, #tpu.memory_space<vmem>>, vector<1x8x8xf32>
    %85 = vector.shape_cast %84 : vector<1x8x8xf32> to vector<8x8xf32>
    %86 = vector.shape_cast %83 : vector<8x8xf32> to vector<1x8x8xf32>
    tpu.vector_store %arg4[%c1_50, %c8_51, %c0_52], %86 {strides = array<i32>} : memref<4x32x8xf32, #tpu.memory_space<vmem>>, vector<1x8x8xf32>,
    %87 = vector.extract_strided_slice %82 {offsets = [8, 0], sizes = [8, 8], strides = [1, 1]} : vector<16x8xf32> to vector<8x8xf32>
    %c1_53 = arith.constant 1 : index
    %c24_54 = arith.constant 24 : index
    %c0_55 = arith.constant 0 : index
    %88 = vector.load %arg4[%c1_53, %c24_54, %c0_55] : memref<4x32x8xf32, #tpu.memory_space<vmem>>, vector<1x8x8xf32>
    %89 = vector.shape_cast %88 : vector<1x8x8xf32> to vector<8x8xf32>
    %90 = vector.shape_cast %87 : vector<8x8xf32> to vector<1x8x8xf32>
    tpu.vector_store %arg4[%c1_53, %c24_54, %c0_55], %90 {strides = array<i32>} : memref<4x32x8xf32, #tpu.memory_space<vmem>>, vector<1x8x8xf32>,
    %c2 = arith.constant 2 : index
    %c0_56 = arith.constant 0 : index
    %c0_57 = arith.constant 0 : index
    %91 = vector.load %arg1[%c2, %c0_56, %c0_57] : memref<4x16x16xf32, #tpu.memory_space<vmem>>, vector<1x16x16xf32>
    %92 = vector.shape_cast %91 : vector<1x16x16xf32> to vector<16x16xf32>
    %93 = arith.truncf %92 : vector<16x16xf32> to vector<16x16xbf16>
    %94 = arith.extf %93 : vector<16x16xbf16> to vector<16x16xf32>
    %95 = arith.subf %92, %94 : vector<16x16xf32>
    %96 = arith.truncf %95 : vector<16x16xf32> to vector<16x16xbf16>
    %97 = arith.extf %96 : vector<16x16xbf16> to vector<16x16xf32>
    %98 = arith.subf %95, %97 : vector<16x16xf32>
    %99 = arith.truncf %98 : vector<16x16xf32> to vector<16x16xbf16>
    %cst_58 = arith.constant dense<0.000000e+00> : vector<16x16xf32>
    %100 = tpu.matmul %0, %93, %cst_58 {dimension_numbers = #tpu.dot_dimension_numbers<[1], [0], [0], [1], [0, 0, 1, 1], [], []>} : vector<16x16xbf16>, vector<16x16xbf16>, vector<16x16xf32> -> vector<16x16xf32>
    %101 = arith.truncf %100 : vector<16x16xf32> to vector<16x16xbf16>
    %cst_59 = arith.constant dense<0.000000e+00> : vector<16x16xf32>
    %102 = tpu.matmul %0, %96, %cst_59 {dimension_numbers = #tpu.dot_dimension_numbers<[1], [0], [0], [1], [0, 0, 1, 1], [], []>} : vector<16x16xbf16>, vector<16x16xbf16>, vector<16x16xf32> -> vector<16x16xf32>
    %103 = arith.truncf %102 : vector<16x16xf32> to vector<16x16xbf16>
    %cst_60 = arith.constant dense<0.000000e+00> : vector<16x16xf32>
    %104 = tpu.matmul %0, %99, %cst_60 {dimension_numbers = #tpu.dot_dimension_numbers<[1], [0], [0], [1], [0, 0, 1, 1], [], []>} : vector<16x16xbf16>, vector<16x16xbf16>, vector<16x16xf32> -> vector<16x16xf32>
    %105 = arith.truncf %104 : vector<16x16xf32> to vector<16x16xbf16>
    %c0_61 = arith.constant 0 : index
    %c0_62 = arith.constant 0 : index
    %c0_63 = arith.constant 0 : index
    %106 = vector.load %arg3[%c0_61, %c0_62, %c0_63] : memref<2x16x8xbf16, #tpu.memory_space<vmem>>, vector<1x16x8xbf16>
    %107 = vector.shape_cast %106 : vector<1x16x8xbf16> to vector<16x8xbf16>
    %cst_64 = arith.constant dense<0.000000e+00> : vector<16x8xf32>
    %108 = tpu.matmul %101, %107, %cst_64 {dimension_numbers = #tpu.dot_dimension_numbers<[1], [0], [0], [1], [0, 0, 1, 1], [], []>} : vector<16x16xbf16>, vector<16x8xbf16>, vector<16x8xf32> -> vector<16x8xf32>
    %cst_65 = arith.constant dense<0.000000e+00> : vector<16x8xf32>
    %109 = tpu.matmul %103, %107, %cst_65 {dimension_numbers = #tpu.dot_dimension_numbers<[1], [0], [0], [1], [0, 0, 1, 1], [], []>} : vector<16x16xbf16>, vector<16x8xbf16>, vector<16x8xf32> -> vector<16x8xf32>
    %110 = arith.addf %108, %109 : vector<16x8xf32>
    %cst_66 = arith.constant dense<0.000000e+00> : vector<16x8xf32>
    %111 = tpu.matmul %105, %107, %cst_66 {dimension_numbers = #tpu.dot_dimension_numbers<[1], [0], [0], [1], [0, 0, 1, 1], [], []>} : vector<16x16xbf16>, vector<16x8xbf16>, vector<16x8xf32> -> vector<16x8xf32>
    %112 = arith.addf %110, %111 : vector<16x8xf32>
    %113 = vector.extract_strided_slice %112 {offsets = [0, 0], sizes = [8, 8], strides = [1, 1]} : vector<16x8xf32> to vector<8x8xf32>
    %c2_67 = arith.constant 2 : index
    %c0_68 = arith.constant 0 : index
    %c0_69 = arith.constant 0 : index
    %114 = vector.load %arg4[%c2_67, %c0_68, %c0_69] : memref<4x32x8xf32, #tpu.memory_space<vmem>>, vector<1x8x8xf32>
    %115 = vector.shape_cast %114 : vector<1x8x8xf32> to vector<8x8xf32>
    %116 = vector.shape_cast %113 : vector<8x8xf32> to vector<1x8x8xf32>
    tpu.vector_store %arg4[%c2_67, %c0_68, %c0_69], %116 {strides = array<i32>} : memref<4x32x8xf32, #tpu.memory_space<vmem>>, vector<1x8x8xf32>,
    %117 = vector.extract_strided_slice %112 {offsets = [8, 0], sizes = [8, 8], strides = [1, 1]} : vector<16x8xf32> to vector<8x8xf32>
    %c2_70 = arith.constant 2 : index
    %c16_71 = arith.constant 16 : index
    %c0_72 = arith.constant 0 : index
    %118 = vector.load %arg4[%c2_70, %c16_71, %c0_72] : memref<4x32x8xf32, #tpu.memory_space<vmem>>, vector<1x8x8xf32>
    %119 = vector.shape_cast %118 : vector<1x8x8xf32> to vector<8x8xf32>
    %120 = vector.shape_cast %117 : vector<8x8xf32> to vector<1x8x8xf32>
    tpu.vector_store %arg4[%c2_70, %c16_71, %c0_72], %120 {strides = array<i32>} : memref<4x32x8xf32, #tpu.memory_space<vmem>>, vector<1x8x8xf32>,
    %c1_73 = arith.constant 1 : index
    %c0_74 = arith.constant 0 : index
    %c0_75 = arith.constant 0 : index
    %121 = vector.load %arg3[%c1_73, %c0_74, %c0_75] : memref<2x16x8xbf16, #tpu.memory_space<vmem>>, vector<1x16x8xbf16>
    %122 = vector.shape_cast %121 : vector<1x16x8xbf16> to vector<16x8xbf16>
    %cst_76 = arith.constant dense<0.000000e+00> : vector<16x8xf32>
    %123 = tpu.matmul %101, %122, %cst_76 {dimension_numbers = #tpu.dot_dimension_numbers<[1], [0], [0], [1], [0, 0, 1, 1], [], []>} : vector<16x16xbf16>, vector<16x8xbf16>, vector<16x8xf32> -> vector<16x8xf32>
    %cst_77 = arith.constant dense<0.000000e+00> : vector<16x8xf32>
    %124 = tpu.matmul %103, %122, %cst_77 {dimension_numbers = #tpu.dot_dimension_numbers<[1], [0], [0], [1], [0, 0, 1, 1], [], []>} : vector<16x16xbf16>, vector<16x8xbf16>, vector<16x8xf32> -> vector<16x8xf32>
    %125 = arith.addf %123, %124 : vector<16x8xf32>
    %cst_78 = arith.constant dense<0.000000e+00> : vector<16x8xf32>
    %126 = tpu.matmul %105, %122, %cst_78 {dimension_numbers = #tpu.dot_dimension_numbers<[1], [0], [0], [1], [0, 0, 1, 1], [], []>} : vector<16x16xbf16>, vector<16x8xbf16>, vector<16x8xf32> -> vector<16x8xf32>
    %127 = arith.addf %125, %126 : vector<16x8xf32>
    %128 = vector.extract_strided_slice %127 {offsets = [0, 0], sizes = [8, 8], strides = [1, 1]} : vector<16x8xf32> to vector<8x8xf32>
    %c2_79 = arith.constant 2 : index
    %c8_80 = arith.constant 8 : index
    %c0_81 = arith.constant 0 : index
    %129 = vector.load %arg4[%c2_79, %c8_80, %c0_81] : memref<4x32x8xf32, #tpu.memory_space<vmem>>, vector<1x8x8xf32>
    %130 = vector.shape_cast %129 : vector<1x8x8xf32> to vector<8x8xf32>
    %131 = vector.shape_cast %128 : vector<8x8xf32> to vector<1x8x8xf32>
    tpu.vector_store %arg4[%c2_79, %c8_80, %c0_81], %131 {strides = array<i32>} : memref<4x32x8xf32, #tpu.memory_space<vmem>>, vector<1x8x8xf32>,
    %132 = vector.extract_strided_slice %127 {offsets = [8, 0], sizes = [8, 8], strides = [1, 1]} : vector<16x8xf32> to vector<8x8xf32>
    %c2_82 = arith.constant 2 : index
    %c24_83 = arith.constant 24 : index
    %c0_84 = arith.constant 0 : index
    %133 = vector.load %arg4[%c2_82, %c24_83, %c0_84] : memref<4x32x8xf32, #tpu.memory_space<vmem>>, vector<1x8x8xf32>
    %134 = vector.shape_cast %133 : vector<1x8x8xf32> to vector<8x8xf32>
    %135 = vector.shape_cast %132 : vector<8x8xf32> to vector<1x8x8xf32>
    tpu.vector_store %arg4[%c2_82, %c24_83, %c0_84], %135 {strides = array<i32>} : memref<4x32x8xf32, #tpu.memory_space<vmem>>, vector<1x8x8xf32>,
    %c3 = arith.constant 3 : index
    %c0_85 = arith.constant 0 : index
    %c0_86 = arith.constant 0 : index
    %136 = vector.load %arg1[%c3, %c0_85, %c0_86] : memref<4x16x16xf32, #tpu.memory_space<vmem>>, vector<1x16x16xf32>
    %137 = vector.shape_cast %136 : vector<1x16x16xf32> to vector<16x16xf32>
    %138 = arith.truncf %137 : vector<16x16xf32> to vector<16x16xbf16>
    %139 = arith.extf %138 : vector<16x16xbf16> to vector<16x16xf32>
    %140 = arith.subf %137, %139 : vector<16x16xf32>
    %141 = arith.truncf %140 : vector<16x16xf32> to vector<16x16xbf16>
    %142 = arith.extf %141 : vector<16x16xbf16> to vector<16x16xf32>
    %143 = arith.subf %140, %142 : vector<16x16xf32>
    %144 = arith.truncf %143 : vector<16x16xf32> to vector<16x16xbf16>
    %cst_87 = arith.constant dense<0.000000e+00> : vector<16x16xf32>
    %145 = tpu.matmul %0, %138, %cst_87 {dimension_numbers = #tpu.dot_dimension_numbers<[1], [0], [0], [1], [0, 0, 1, 1], [], []>} : vector<16x16xbf16>, vector<16x16xbf16>, vector<16x16xf32> -> vector<16x16xf32>
    %146 = arith.truncf %145 : vector<16x16xf32> to vector<16x16xbf16>
    %cst_88 = arith.constant dense<0.000000e+00> : vector<16x16xf32>
    %147 = tpu.matmul %0, %141, %cst_88 {dimension_numbers = #tpu.dot_dimension_numbers<[1], [0], [0], [1], [0, 0, 1, 1], [], []>} : vector<16x16xbf16>, vector<16x16xbf16>, vector<16x16xf32> -> vector<16x16xf32>
    %148 = arith.truncf %147 : vector<16x16xf32> to vector<16x16xbf16>
    %cst_89 = arith.constant dense<0.000000e+00> : vector<16x16xf32>
    %149 = tpu.matmul %0, %144, %cst_89 {dimension_numbers = #tpu.dot_dimension_numbers<[1], [0], [0], [1], [0, 0, 1, 1], [], []>} : vector<16x16xbf16>, vector<16x16xbf16>, vector<16x16xf32> -> vector<16x16xf32>
    %150 = arith.truncf %149 : vector<16x16xf32> to vector<16x16xbf16>
    %c0_90 = arith.constant 0 : index
    %c0_91 = arith.constant 0 : index
    %c0_92 = arith.constant 0 : index
    %151 = vector.load %arg3[%c0_90, %c0_91, %c0_92] : memref<2x16x8xbf16, #tpu.memory_space<vmem>>, vector<1x16x8xbf16>
    %152 = vector.shape_cast %151 : vector<1x16x8xbf16> to vector<16x8xbf16>
    %cst_93 = arith.constant dense<0.000000e+00> : vector<16x8xf32>
    %153 = tpu.matmul %146, %152, %cst_93 {dimension_numbers = #tpu.dot_dimension_numbers<[1], [0], [0], [1], [0, 0, 1, 1], [], []>} : vector<16x16xbf16>, vector<16x8xbf16>, vector<16x8xf32> -> vector<16x8xf32>
    %cst_94 = arith.constant dense<0.000000e+00> : vector<16x8xf32>
    %154 = tpu.matmul %148, %152, %cst_94 {dimension_numbers = #tpu.dot_dimension_numbers<[1], [0], [0], [1], [0, 0, 1, 1], [], []>} : vector<16x16xbf16>, vector<16x8xbf16>, vector<16x8xf32> -> vector<16x8xf32>
    %155 = arith.addf %153, %154 : vector<16x8xf32>
    %cst_95 = arith.constant dense<0.000000e+00> : vector<16x8xf32>
    %156 = tpu.matmul %150, %152, %cst_95 {dimension_numbers = #tpu.dot_dimension_numbers<[1], [0], [0], [1], [0, 0, 1, 1], [], []>} : vector<16x16xbf16>, vector<16x8xbf16>, vector<16x8xf32> -> vector<16x8xf32>
    %157 = arith.addf %155, %156 : vector<16x8xf32>
    %158 = vector.extract_strided_slice %157 {offsets = [0, 0], sizes = [8, 8], strides = [1, 1]} : vector<16x8xf32> to vector<8x8xf32>
    %c3_96 = arith.constant 3 : index
    %c0_97 = arith.constant 0 : index
    %c0_98 = arith.constant 0 : index
    %159 = vector.load %arg4[%c3_96, %c0_97, %c0_98] : memref<4x32x8xf32, #tpu.memory_space<vmem>>, vector<1x8x8xf32>
    %160 = vector.shape_cast %159 : vector<1x8x8xf32> to vector<8x8xf32>
    %161 = vector.shape_cast %158 : vector<8x8xf32> to vector<1x8x8xf32>
    tpu.vector_store %arg4[%c3_96, %c0_97, %c0_98], %161 {strides = array<i32>} : memref<4x32x8xf32, #tpu.memory_space<vmem>>, vector<1x8x8xf32>,
    %162 = vector.extract_strided_slice %157 {offsets = [8, 0], sizes = [8, 8], strides = [1, 1]} : vector<16x8xf32> to vector<8x8xf32>
    %c3_99 = arith.constant 3 : index
    %c16_100 = arith.constant 16 : index
    %c0_101 = arith.constant 0 : index
    %163 = vector.load %arg4[%c3_99, %c16_100, %c0_101] : memref<4x32x8xf32, #tpu.memory_space<vmem>>, vector<1x8x8xf32>
    %164 = vector.shape_cast %163 : vector<1x8x8xf32> to vector<8x8xf32>
    %165 = vector.shape_cast %162 : vector<8x8xf32> to vector<1x8x8xf32>
    tpu.vector_store %arg4[%c3_99, %c16_100, %c0_101], %165 {strides = array<i32>} : memref<4x32x8xf32, #tpu.memory_space<vmem>>, vector<1x8x8xf32>,
    %c1_102 = arith.constant 1 : index
    %c0_103 = arith.constant 0 : index
    %c0_104 = arith.constant 0 : index
    %166 = vector.load %arg3[%c1_102, %c0_103, %c0_104] : memref<2x16x8xbf16, #tpu.memory_space<vmem>>, vector<1x16x8xbf16>
    %167 = vector.shape_cast %166 : vector<1x16x8xbf16> to vector<16x8xbf16>
    %cst_105 = arith.constant dense<0.000000e+00> : vector<16x8xf32>
    %168 = tpu.matmul %146, %167, %cst_105 {dimension_numbers = #tpu.dot_dimension_numbers<[1], [0], [0], [1], [0, 0, 1, 1], [], []>} : vector<16x16xbf16>, vector<16x8xbf16>, vector<16x8xf32> -> vector<16x8xf32>
    %cst_106 = arith.constant dense<0.000000e+00> : vector<16x8xf32>
    %169 = tpu.matmul %148, %167, %cst_106 {dimension_numbers = #tpu.dot_dimension_numbers<[1], [0], [0], [1], [0, 0, 1, 1], [], []>} : vector<16x16xbf16>, vector<16x8xbf16>, vector<16x8xf32> -> vector<16x8xf32>
    %170 = arith.addf %168, %169 : vector<16x8xf32>
    %cst_107 = arith.constant dense<0.000000e+00> : vector<16x8xf32>
    %171 = tpu.matmul %150, %167, %cst_107 {dimension_numbers = #tpu.dot_dimension_numbers<[1], [0], [0], [1], [0, 0, 1, 1], [], []>} : vector<16x16xbf16>, vector<16x8xbf16>, vector<16x8xf32> -> vector<16x8xf32>
    %172 = arith.addf %170, %171 : vector<16x8xf32>
    %173 = vector.extract_strided_slice %172 {offsets = [0, 0], sizes = [8, 8], strides = [1, 1]} : vector<16x8xf32> to vector<8x8xf32>
    %c3_108 = arith.constant 3 : index
    %c8_109 = arith.constant 8 : index
    %c0_110 = arith.constant 0 : index
    %174 = vector.load %arg4[%c3_108, %c8_109, %c0_110] : memref<4x32x8xf32, #tpu.memory_space<vmem>>, vector<1x8x8xf32>
    %175 = vector.shape_cast %174 : vector<1x8x8xf32> to vector<8x8xf32>
    %176 = vector.shape_cast %173 : vector<8x8xf32> to vector<1x8x8xf32>
    tpu.vector_store %arg4[%c3_108, %c8_109, %c0_110], %176 {strides = array<i32>} : memref<4x32x8xf32, #tpu.memory_space<vmem>>, vector<1x8x8xf32>,
    %177 = vector.extract_strided_slice %172 {offsets = [8, 0], sizes = [8, 8], strides = [1, 1]} : vector<16x8xf32> to vector<8x8xf32>
    %c3_111 = arith.constant 3 : index
    %c24_112 = arith.constant 24 : index
    %c0_113 = arith.constant 0 : index
    %178 = vector.load %arg4[%c3_111, %c24_112, %c0_113] : memref<4x32x8xf32, #tpu.memory_space<vmem>>, vector<1x8x8xf32>
    %179 = vector.shape_cast %178 : vector<1x8x8xf32> to vector<8x8xf32>
    %180 = vector.shape_cast %177 : vector<8x8xf32> to vector<1x8x8xf32>
    tpu.vector_store %arg4[%c3_111, %c24_112, %c0_113], %180 {strides = array<i32>} : memref<4x32x8xf32, #tpu.memory_space<vmem>>, vector<1x8x8xf32>,
    return
  }
  func.func @transform_0(%arg0: i32) -> (i32, i32, i32) {
    %c0_i32 = arith.constant 0 : i32
    %c0_i32_0 = arith.constant 0 : i32
    %c0_i32_1 = arith.constant 0 : i32
    return %arg0, %c0_i32, %c0_i32_0 : i32, i32, i32
  }
  func.func @transform_1(%arg0: i32) -> (i32, i32) {
    %c0_i32 = arith.constant 0 : i32
    %c0_i32_0 = arith.constant 0 : i32
    %c0_i32_1 = arith.constant 0 : i32
    return %c0_i32, %c0_i32_0 : i32, i32
  }
  func.func @transform_2(%arg0: i32) -> (i32, i32, i32) {
    %c0_i32 = arith.constant 0 : i32
    %c0_i32_0 = arith.constant 0 : i32
    %c0_i32_1 = arith.constant 0 : i32
    %c0_i32_2 = arith.constant 0 : i32
    return %c0_i32, %c0_i32_0, %c0_i32_1 : i32, i32, i32
  }
  func.func @transform_3(%arg0: i32) -> (i32, i32, i32) {
    %c0_i32 = arith.constant 0 : i32
    %c0_i32_0 = arith.constant 0 : i32
    %c0_i32_1 = arith.constant 0 : i32
    return %arg0, %c0_i32, %c0_i32_0 : i32, i32, i32
  }
}

</mosaic_0001>

<bundles_post_ra>
// kernel: tpu_custom_call.1
= control target key start
LH: loop header
LB: loop body
LE: loop exit
PB: predicated region body
PF: predicated region fallthrough
CT: control target
= control target key end

     0   :  { %8 = vsyncpa [#allocation3], 0  ;;  %s2877_s0 = inlined_call_operand.hbm [shape: f32[8,16,16], index: 0, kind: input, shape index: {}]   ;;  %s2878_s1 = inlined_call_operand.vmem [shape: bf16[16,16], index: 1, kind: input, shape index: {}]   ;;  %s2879_s2 = inlined_call_operand.vmem [shape: bf16[2,16,8], index: 2, kind: input, shape index: {}]   ;;  %s2880_s3 = inlined_call_operand.vmem [shape: f32[8,32,8], index: 3, kind: output, shape index: {}]  }
   0x1   :  { %10 = vsyncpa [#allocation3 + $0x1], 0  ;;  %s2541_s12 = smov 0   ;;  %s2543_s13 = smov 0  }
   0x2   :  { %s2545_s14 = smov 0   ;;  %s2547_s15 = smov 0  }
   0x3 LB: > { %s1957_s16 = sadd.s32 4294967295, %s2514_s15   ;;  %s2561_s17 = sadd.s32 1, %s2514_s15   ;;  %s2514_s15 = sphi %s2547_s15, %s2887_s15   ;;  %s2510_s14 = sphi %s2545_s14, %s2886_s14   ;;  %s2506_s13 = sphi %s2543_s13, %s2885_s13   ;;  %s2502_s12 = sphi %s2541_s12, %s2884_s12  }
   0x4   : > { %s20_s18 = ssub.s32 %s2514_s15, %s2561_s17  ;;  %s23_s19 = sadd.s32 1, %s2510_s14 }
   0x5   : > { %p21_p0 = scmp.eq.s32.totalorder %s20_s18, 0  ;;  %p30_p1 = scmp.ne.s32.totalorder %s2510_s14, %s2506_s13 }
   0x6   : > { %p31_p2 = scmp.eq.s32.totalorder %s2514_s15, 0  ;;  %p36_p3 = scmp.ne.s32.totalorder %s2506_s13, %s2502_s12 }
   0x7   : > { %s2571_s20 = scalar_select %p21_p0, %s2510_s14, %s23_s19  }
   0x8   : > { %p32_p4 = por %p31_p2, %p30_p1  ;;  %p37_p5 = scmp.eq.s32.totalorder %s1957_s16, 0 }
   0x9   : > { %p2404_p6 = scmp.lt.s32.totalorder %s2514_s15, 2  ;;  %s134_s22 = sand.u32 1, %s2510_s14  }
   0xa   : > { %p2576_p7 = por %p37_p5, %p36_p3  ;;  %s1961_s23 = sshll.u32 %s134_s22, 6 }
   0xb   : > { %s2044_s24 = sshll.u32 %s2514_s15, 10  ;;  %s138_s28 = scalar_lea.vmem [#allocation2], %s1961_s23 }
   0xc   : > { %s2585_s27 = scalar_lea.hbm %s2877_s0, %s2044_s24  ;;  %s146_s29 = sshll.u32 %s138_s28, 4  ;;  %s2587_s29 = int_to_ptr.vmem [resolvable:$true] %s146_s29 }
   0xd   : > { %p2589_p8 = pnand %p2404_p6, %p32_p4  ;;  %s2594_s4 = scalar_lea.sflag [#allocation3], %s134_s22 }
   0xe   : > { %s2450_s5 = scalar_lea.hbm %s2585_s27, 1024  ;;  %s2455_s8 = scalar_lea.hbm %s2877_s0, 2048 }
   0xf   : > { %p2451_p10 = scmp.ne.s32.totalorder %s2585_s27, %s2450_s5  ;;  %p2452_p11 = pneg %p2589_p8 }
  0x10   : > { %p2456_p0 = scmp.lt.u32.totalorder %s2585_s27, %s2877_s0  ;;  %p2457_p1 = scmp.lt.u32.totalorder %s2455_s8, %s2450_s5 }
  0x11   : > { %p2453_p12 = pnand %p2452_p11, %p2451_p10  ;;  %p2459_p3 = scmp.lt.u32.totalorder %s2450_s5, %s2585_s27 }
  0x12   : > { %p2458_p2 = por %p2457_p1, %p2456_p0 }
  0x13   : > { %p2454_p13 = pneg %p2453_p12 }
  0x14   : > { %p2460_p4 = por %p2459_p3, %p2458_p2 }
  0x16   : > { %p2461_p5 = pnand %p2460_p4, %p2454_p13 }
  0x18   : > { %2464 = shalt.err (!%p2461_p5)
}
  0x19   : > { %s2465_s11 = scalar_lea.vmem %s2587_s29, 1024  ;;  %s2516_s12 = smov [#allocation2]  }
  0x1a   : > { %p2466_p6 = scmp.ne.s32.totalorder %s2587_s29, %s2465_s11  ;;  %s2470_s18 = sshll.u32 %s2516_s12, 4  ;;  %s2471_s18 = int_to_ptr.vmem [resolvable:$false] %s2470_s18 }
  0x1b   : > { %s2472_s19 = scalar_lea.vmem %s2471_s18, 2048  ;;  %p2473_p9 = scmp.lt.s32.totalorder %s2587_s29, %s2471_s18 }
  0x1c   : > { %p2468_p10 = pnand %p2466_p6, %p2452_p11  ;;  %p2474_p0 = scmp.lt.s32.totalorder %s2472_s19, %s2465_s11 }
  0x1e   : > { %p2469_p12 = pneg %p2468_p10  ;;  %p2475_p1 = por %p2474_p0, %p2473_p9 }
  0x20   : > { %p2476_p2 = pnand %p2475_p1, %p2469_p12 }
  0x22   : > { %2479 = shalt.err (!%p2476_p2)
}
  0x23   : > { %s2517_s22 = smov 128   ;;  %s2518_s23 = smov 8  }
  0x24   : > { %2403 = dma.hbm_to_vmem [thread:$0]  (!%p2589_p8), %s2585_s27, 1024, %s2587_s29, %s2594_s4, %s2517_s22, %s2517_s22, %s2518_s23  }
  0x25   : > { %p154_p11 = scmp.lt.s32.totalorder %s2514_s15, 3  ;;  %p2883_p13 = scmp.ge.s32.totalorder %s2514_s15, 1 }
  0x27   : > { %p155_p3 = pnand %p2883_p13, %p154_p11 }
  0x28   : > { %s160_s24 = sand.u32 (!%p155_p3), 1, %s2506_s13  }
  0x29   : > { %158 = sbr.rel (%p155_p3) target bundleno = 1260 (0x4ec), region = 32  ;;  %s1966_s25 = sshll.u32 (!%p155_p3), %s160_s24, 6 }
  0x2a   : > { %s161_s26 = scalar_lea.sflag (!%p155_p3), [#allocation3], %s160_s24  ;;  %s2626_s28 = scalar_lea.vmem (!%p155_p3), [#allocation2], %s1966_s25 }
  0x30   : > { %2497 = dma.done.wait (%p2576_p7), %s161_s26, 1024  }
  0x31   : > { %2499 = vsyncadd (%p2576_p7), %s161_s26, 4294966272  ;;  %v2519_v0 = vmov 0.0   ;;  %vm2520_vm0 = vmmov 0   ;;  %v199_v1 = vld [vmem:[%s2626_s28] sm:$0xff]  ;;  %v200_v2 = vld [vmem:[%s2626_s28 + $0x8] sm:$0xff]  ;;  %vm217_vm1 = vcmask 130048  }
  0x32   : > { %2124 = vmatprep.subr.bf16.mxu1 %v2519_v0  ;;  %2126 = vmatprep.mubr.msk.bf16.mxu1 %vm2520_vm0, %v2519_v0  ;;  %v201_v3 = vpack.c.bf16 %v200_v2, %v199_v1  ;;  %v2643_v4 = vld [vmem:[%s2878_s1] sm:$0xff]   ;;  %v2442_v15 = vld [vmem:[%s2879_s2 + $0x8] sm:$0xff]   ;;  %v1984_v32 = vld [vmem:[%s2626_s28 + $0x10] sm:$0xff]  ;;  %s1967_s10 = sshll.u32 %s1957_s16, 2  ;;  %vm489_vm2 = vcmask 64512  }
  0x33   : > { %2118 = vmatprep.subr.bf16.mxu0 %v2519_v0  ;;  %2120 = vmatprep.mubr.msk.bf16.mxu0 %vm2520_vm0, %v2519_v0  ;;  %v2443_v16 = vld [vmem:[%s2879_s2] sm:$0xff]   ;;  %v1985_v33 = vld [vmem:[%s2626_s28 + $0x18] sm:$0xff]  ;;  %v2444_v45 = vld [vmem:[%s2879_s2 + $0x8] sm:$0xff]   ;;  %p190_p7 = scmp.lt.s32.totalorder %s1967_s10, 7 }
  0x34   : > { %v202_v5 = vunpack.c.l.bf16 %v201_v3  ;;  %v203_v6 = vunpack.c.h.bf16 %v201_v3  ;;  %2119 = vmatpush3.bf16.msra.mxu0 %v201_v3  ;;  %v631_v34 = vpack.c.bf16 %v1985_v33, %v1984_v32  ;;  %v2445_v46 = vld [vmem:[%s2879_s2] sm:$0xff]  }
  0x35   : > { %2130 = vmatprep.subr.bf16.mxu0 %v2519_v0  ;;  %s2889_s10 = smov (!%p190_p7, %s1967_s10), 7 }
  0x36   : > { %v204_v7 = vsub.f32 %v199_v1, %v202_v5  ;;  %v205_v8 = vsub.f32 %v200_v2, %v203_v6  ;;  %v632_v35 = vunpack.c.l.bf16 %v631_v34  ;;  %v633_v36 = vunpack.c.h.bf16 %v631_v34  ;;  %s2045_s11 = sshll.u32 %s2889_s10, 5  ;;  %v2003_v5 = vld [vmem:[%s2626_s28 + $0x20] sm:$0xff]  ;;  %v2004_v6 = vld [vmem:[%s2626_s28 + $0x28] sm:$0xff] }
  0x37   : > { %2121 = vmatmul.mubr.msk.bf16.vlgmr.msra.gmra.mrb[0].mxu0 %vm217_vm1, %v2643_v4  ;;  %s2720_s19 = scalar_lea.vmem %s2880_s3, %s2045_s11 }
  0x38   : > { %v206_v9 = vpack.c.bf16 %v205_v8, %v204_v7  ;;  %2132 = vmatprep.mubr.msk.bf16.mxu0 %vm2520_vm0, %v2519_v0  ;;  %v634_v37 = vsub.f32 %v1984_v32, %v632_v35  ;;  %v635_v38 = vsub.f32 %v1985_v33, %v633_v36 }
  0x3a   : > { %v207_v10 = vunpack.c.l.bf16 %v206_v9  ;;  %v208_v11 = vunpack.c.h.bf16 %v206_v9  ;;  %2125 = vmatpush3.bf16.msra.mxu1 %v206_v9  ;;  %v636_v39 = vpack.c.bf16 %v635_v38, %v634_v37 }
  0x3b   : > { %2136 = vmatprep.subr.bf16.mxu1 %v2519_v0 }
  0x3c   : > { %v209_v12 = vsub.f32 %v204_v7, %v207_v10  ;;  %v210_v13 = vsub.f32 %v205_v8, %v208_v11  ;;  %v637_v40 = vunpack.c.l.bf16 %v636_v39  ;;  %v638_v41 = vunpack.c.h.bf16 %v636_v39 }
  0x3d   : > { %2127 = vmatmul.mubr.msk.bf16.vlgmr.msra.gmra.mrb[0].mxu1 %vm217_vm1, %v2643_v4  ;;  %v1051_v10 = vpack.c.bf16 %v2004_v6, %v2003_v5 }
  0x3e   : > { %v211_v14 = vpack.c.bf16 %v210_v13, %v209_v12  ;;  %2138 = vmatprep.mubr.msk.bf16.mxu1 %vm2520_vm0, %v2519_v0  ;;  %2137 = vmatpush3.bf16.msra.mxu1 %v2443_v16  ;;  %v639_v42 = vsub.f32 %v634_v37, %v637_v40  ;;  %v640_v43 = vsub.f32 %v635_v38, %v638_v41 }
  0x3f   : > { %2142 = vmatprep.subr.bf16.mxu1 %v2519_v0  ;;  %v1052_v11 = vunpack.c.l.bf16 %v1051_v10  ;;  %v1053_v12 = vunpack.c.h.bf16 %v1051_v10 }
  0x40   : > { %2131 = vmatpush3.bf16.msra.mxu0 %v211_v14  ;;  %v641_v44 = vpack.c.bf16 %v640_v43, %v639_v42  ;;  %v2022_v43 = vld [vmem:[%s2626_s28 + $0x30] sm:$0xff] }
  0x41   : > { %2154 = vmatprep.subr.bf16.mxu0 %v2519_v0  ;;  %v1054_v13 = vsub.f32 %v2003_v5, %v1052_v11  ;;  %v1055_v14 = vsub.f32 %v2004_v6, %v1053_v12 }
  0x43   : > { %2133 = vmatmul.mubr.msk.bf16.vlgmr.msra.gmra.mrb[4].mxu0 %vm217_vm1, %v2643_v4 }
  0x44   : > { %2155 = vmatpush3.bf16.msra.mxu0 %v2442_v15  ;;  %2156 = vmatprep.mubr.msk.bf16.mxu0 %vm2520_vm0, %v2519_v0 }
  0x45   : > { %2160 = vmatprep.subr.bf16.mxu0 %v2519_v0 }
 0x10a   : > { %v255_v17 = vpop.f32.mrb[0].mxu0 }
 0x10b   : > { %v2122_v18 = vpop.f32.mrb[1].mxu0 }
 0x10c   : > { %v258_v19 = vpop.f32.mrb[2].mxu0 }
 0x10d   : > { %v262_v20 = vpack.c.bf16 %v258_v19, %v255_v17  ;;  %v2123_v21 = vpop.f32.mrb[3].mxu0 }
 0x10e   : > { %v2446_v21 = vld [vmem:[%s2879_s2 + $0x8] sm:$0xff]  }
 0x110   : > { %v297_v22 = vpop.f32.mrb[0].mxu1 }
 0x111   : > { %v2128_v23 = vpop.f32.mrb[1].mxu1 }
 0x112   : > { %v300_v24 = vpop.f32.mrb[2].mxu1 }
 0x113   : > { %v304_v25 = vpack.c.bf16 %v300_v24, %v297_v22  ;;  %v2129_v26 = vpop.f32.mrb[3].mxu1  ;;  %v2447_v22 = vld [vmem:[%s2879_s2] sm:$0xff]  }
 0x115   : > { %2139 = vmatmul.mubr.msk.bf16.vlgmr.msra.gmra.mrb[4].mxu1 %vm217_vm1, %v304_v25  ;;  %2157 = vmatmul.mubr.msk.bf16.vlgmr.msra.gmra.mrb[8].mxu0 %vm217_vm1, %v304_v25 }
 0x116   : > { %2161 = vmatpush3.bf16.msra.mxu0 %v2442_v15  ;;  %2143 = vmatpush3.bf16.msra.mxu1 %v2443_v16  ;;  %v339_v27 = vpop.f32.mrb[4].mxu0 }
 0x117   : > { %2144 = vmatprep.mubr.msk.bf16.mxu1 %vm2520_vm0, %v2519_v0  ;;  %2162 = vmatprep.mubr.msk.bf16.mxu0 %vm2520_vm0, %v2519_v0  ;;  %v2134_v28 = vpop.f32.mrb[5].mxu0 }
 0x118   : > { %2166 = vmatprep.subr.bf16.mxu0 %v2519_v0  ;;  %v342_v29 = vpop.f32.mrb[6].mxu0  ;;  %2148 = vmatprep.subr.bf16.mxu1 %v2519_v0 }
 0x119   : > { %v346_v30 = vpack.c.bf16 %v342_v29, %v339_v27  ;;  %v2135_v31 = vpop.f32.mrb[7].mxu0 }
 0x121   : > { %2145 = vmatmul.mubr.msk.bf16.vlgmr.msra.gmra.mrb[4].mxu1 %vm217_vm1, %v262_v20  ;;  %2163 = vmatmul.mubr.msk.bf16.vlgmr.msra.gmra.mrb[8].mxu0 %vm217_vm1, %v262_v20 }
 0x122   : > { %2167 = vmatpush3.bf16.msra.mxu0 %v2442_v15  ;;  %2149 = vmatpush3.bf16.msra.mxu1 %v2443_v16  ;;  %v1056_v15 = vpack.c.bf16 %v1055_v14, %v1054_v13 }
 0x123   : > { %2150 = vmatprep.mubr.msk.bf16.mxu1 %vm2520_vm0, %v2519_v0  ;;  %2168 = vmatprep.mubr.msk.bf16.mxu0 %vm2520_vm0, %v2519_v0 }
 0x124   : > { %2178 = vmatprep.subr.bf16.mxu0 %v2519_v0  ;;  %2172 = vmatprep.subr.bf16.mxu1 %v2519_v0  ;;  %v1057_v16 = vunpack.c.l.bf16 %v1056_v15  ;;  %v1058_v17 = vunpack.c.h.bf16 %v1056_v15 }
 0x126   : > { %v1059_v18 = vsub.f32 %v1054_v13, %v1057_v16  ;;  %v1060_v19 = vsub.f32 %v1055_v14, %v1058_v17 }
 0x128   : > { %v1061_v20 = vpack.c.bf16 %v1060_v19, %v1059_v18 }
 0x12d   : > { %2151 = vmatmul.mubr.msk.bf16.vlgmr.msra.gmra.mrb[4].mxu1 %vm217_vm1, %v346_v30  ;;  %2169 = vmatmul.mubr.msk.bf16.vlgmr.msra.gmra.mrb[8].mxu0 %vm217_vm1, %v346_v30 }
 0x12e   : > { %2179 = vmatpush3.bf16.msra.mxu0 %v636_v39  ;;  %2180 = vmatprep.mubr.msk.bf16.mxu0 %vm2520_vm0, %v2519_v0 }
 0x12f   : > { %2173 = vmatpush3.bf16.msra.mxu1 %v631_v34  ;;  %2174 = vmatprep.mubr.msk.bf16.mxu1 %vm2520_vm0, %v2519_v0 }
 0x130   : > { %2184 = vmatprep.subr.bf16.mxu1 %v2519_v0  ;;  %2190 = vmatprep.subr.bf16.mxu0 %v2519_v0 }
 0x135   : > { %2181 = vmatmul.mubr.msk.bf16.vlgmr.msra.gmra.mrb[12].mxu0 %vm217_vm1, %v2643_v4  ;;  %2175 = vmatmul.mubr.msk.bf16.vlgmr.msra.gmra.mrb[8].mxu1 %vm217_vm1, %v2643_v4 }
 0x136   : > { %2185 = vmatpush3.bf16.msra.mxu1 %v641_v44  ;;  %2186 = vmatprep.mubr.msk.bf16.mxu1 %vm2520_vm0, %v2519_v0  ;;  %v2023_v44 = vld [vmem:[%s2626_s28 + $0x38] sm:$0xff] }
 0x137   : > { %2208 = vmatprep.subr.bf16.mxu1 %v2519_v0  ;;  %2192 = vmatprep.mubr.msk.bf16.mxu0 %vm2520_vm0, %v2519_v0 }
 0x138   : > { %2191 = vmatpush3.bf16.msra.mxu0 %v2445_v46 }
 0x139   : > { %2196 = vmatprep.subr.bf16.mxu0 %v2519_v0 }
 0x13d   : > { %2187 = vmatmul.mubr.msk.bf16.vlgmr.msra.gmra.mrb[12].mxu1 %vm217_vm1, %v2643_v4 }
 0x13e   : > { %2210 = vmatprep.mubr.msk.bf16.mxu1 %vm2520_vm0, %v2519_v0  ;;  %2209 = vmatpush3.bf16.msra.mxu1 %v2444_v45 }
 0x13f   : > { %2214 = vmatprep.subr.bf16.mxu1 %v2519_v0 }
 0x200   : > { %v480_v47 = vpop.f32.mrb[4].mxu1  ;;  %v617_v48 = vpop.f32.mrb[8].mxu0 }
 0x201   : > { %490 = vst.msk [vmem:[%s2720_s19] sm:$0xff] %vm489_vm2, %v480_v47  ;;  %626 = vst.msk [vmem:[%s2720_s19 + $0x8] sm:$0xff] %vm489_vm2, %v617_v48  ;;  %v2152_v49 = vpop.f32.mrb[5].mxu1  ;;  %v2170_v50 = vpop.f32.mrb[9].mxu0  ;;  %v1471_v48 = vpack.c.bf16 %v2023_v44, %v2022_v43 }
 0x202   : > { %v483_v51 = vpop.f32.mrb[6].mxu1  ;;  %v620_v52 = vpop.f32.mrb[10].mxu0 }
 0x203   : > { %491 = vst.msk [vmem:[%s2720_s19 + $0x10] sm:$0xff] %vm489_vm2, %v483_v51  ;;  %627 = vst.msk [vmem:[%s2720_s19 + $0x18] sm:$0xff] %vm489_vm2, %v620_v52  ;;  %v2153_v53 = vpop.f32.mrb[7].mxu1  ;;  %v2171_v54 = vpop.f32.mrb[11].mxu0  ;;  %v1472_v49 = vunpack.c.l.bf16 %v1471_v48  ;;  %v1473_v50 = vunpack.c.h.bf16 %v1471_v48 }
 0x205   : > { %v1474_v51 = vsub.f32 %v2022_v43, %v1472_v49  ;;  %v1475_v52 = vsub.f32 %v2023_v44, %v1473_v50 }
 0x207   : > { %v1476_v53 = vpack.c.bf16 %v1475_v52, %v1474_v51 }
 0x208   : > { %v718_v55 = vpop.f32.mrb[12].mxu0  ;;  %v676_v56 = vpop.f32.mrb[8].mxu1 }
 0x209   : > { %v2182_v57 = vpop.f32.mrb[13].mxu0  ;;  %v2176_v58 = vpop.f32.mrb[9].mxu1  ;;  %v1477_v54 = vunpack.c.l.bf16 %v1476_v53 }
 0x20a   : > { %v721_v59 = vpop.f32.mrb[14].mxu0  ;;  %v679_v60 = vpop.f32.mrb[10].mxu1 }
 0x20b   : > { %v725_v61 = vpack.c.bf16 %v721_v59, %v718_v55  ;;  %v2183_v62 = vpop.f32.mrb[15].mxu0  ;;  %v683_v63 = vpack.c.bf16 %v679_v60, %v676_v56  ;;  %v2177_v1 = vpop.f32.mrb[11].mxu1  ;;  %v1478_v55 = vunpack.c.h.bf16 %v1476_v53  ;;  %v1479_v56 = vsub.f32 %v1474_v51, %v1477_v54  ;;  %v2448_v59 = vld [vmem:[%s2879_s2] sm:$0xff]   ;;  %v2449_v60 = vld [vmem:[%s2879_s2 + $0x8] sm:$0xff]  }
 0x20d   : > { %2193 = vmatmul.mubr.msk.bf16.vlgmr.msra.gmra.mrb[16].mxu0 %vm217_vm1, %v725_v61  ;;  %2211 = vmatmul.mubr.msk.bf16.vlgmr.msra.gmra.mrb[16].mxu1 %vm217_vm1, %v725_v61  ;;  %v1480_v57 = vsub.f32 %v1475_v52, %v1478_v55 }
 0x20e   : > { %2215 = vmatpush3.bf16.msra.mxu1 %v2444_v45  ;;  %2197 = vmatpush3.bf16.msra.mxu0 %v2445_v46 }
 0x20f   : > { %2198 = vmatprep.mubr.msk.bf16.mxu0 %vm2520_vm0, %v2519_v0  ;;  %2216 = vmatprep.mubr.msk.bf16.mxu1 %vm2520_vm0, %v2519_v0  ;;  %v1481_v58 = vpack.c.bf16 %v1480_v57, %v1479_v56 }
 0x210   : > { %2220 = vmatprep.subr.bf16.mxu1 %v2519_v0  ;;  %v760_v2 = vpop.f32.mrb[12].mxu1  ;;  %2202 = vmatprep.subr.bf16.mxu0 %v2519_v0 }
 0x211   : > { %v2188_v3 = vpop.f32.mrb[13].mxu1 }
 0x212   : > { %v763_v7 = vpop.f32.mrb[14].mxu1 }
 0x213   : > { %v767_v8 = vpack.c.bf16 %v763_v7, %v760_v2  ;;  %v2189_v9 = vpop.f32.mrb[15].mxu1 }
 0x219   : > { %2199 = vmatmul.mubr.msk.bf16.vlgmr.msra.gmra.mrb[16].mxu0 %vm217_vm1, %v683_v63  ;;  %2217 = vmatmul.mubr.msk.bf16.vlgmr.msra.gmra.mrb[16].mxu1 %vm217_vm1, %v683_v63 }
 0x21a   : > { %2221 = vmatpush3.bf16.msra.mxu1 %v2444_v45  ;;  %2203 = vmatpush3.bf16.msra.mxu0 %v2445_v46 }
 0x21b   : > { %2204 = vmatprep.mubr.msk.bf16.mxu0 %vm2520_vm0, %v2519_v0  ;;  %2222 = vmatprep.mubr.msk.bf16.mxu1 %vm2520_vm0, %v2519_v0 }
 0x21c   : > { %2232 = vmatprep.subr.bf16.mxu1 %v2519_v0  ;;  %2226 = vmatprep.subr.bf16.mxu0 %v2519_v0 }
 0x225   : > { %2205 = vmatmul.mubr.msk.bf16.vlgmr.msra.gmra.mrb[16].mxu0 %vm217_vm1, %v767_v8  ;;  %2223 = vmatmul.mubr.msk.bf16.vlgmr.msra.gmra.mrb[16].mxu1 %vm217_vm1, %v767_v8 }
 0x226   : > { %2233 = vmatpush3.bf16.msra.mxu1 %v1056_v15  ;;  %2234 = vmatprep.mubr.msk.bf16.mxu1 %vm2520_vm0, %v2519_v0 }
 0x227   : > { %2227 = vmatpush3.bf16.msra.mxu0 %v1051_v10  ;;  %2228 = vmatprep.mubr.msk.bf16.mxu0 %vm2520_vm0, %v2519_v0 }
 0x228   : > { %2238 = vmatprep.subr.bf16.mxu0 %v2519_v0  ;;  %2244 = vmatprep.subr.bf16.mxu1 %v2519_v0 }
 0x22d   : > { %2235 = vmatmul.mubr.msk.bf16.vlgmr.msra.gmra.mrb[20].mxu1 %vm217_vm1, %v2643_v4  ;;  %2229 = vmatmul.mubr.msk.bf16.vlgmr.msra.gmra.mrb[20].mxu0 %vm217_vm1, %v2643_v4 }
 0x22e   : > { %2239 = vmatpush3.bf16.msra.mxu0 %v1061_v20  ;;  %2240 = vmatprep.mubr.msk.bf16.mxu0 %vm2520_vm0, %v2519_v0 }
 0x22f   : > { %2262 = vmatprep.subr.bf16.mxu0 %v2519_v0  ;;  %2246 = vmatprep.mubr.msk.bf16.mxu1 %vm2520_vm0, %v2519_v0 }
 0x230   : > { %2245 = vmatpush3.bf16.msra.mxu1 %v2447_v22 }
 0x231   : > { %2250 = vmatprep.subr.bf16.mxu1 %v2519_v0 }
 0x235   : > { %2241 = vmatmul.mubr.msk.bf16.vlgmr.msra.gmra.mrb[24].mxu0 %vm217_vm1, %v2643_v4 }
 0x236   : > { %2264 = vmatprep.mubr.msk.bf16.mxu0 %vm2520_vm0, %v2519_v0  ;;  %2263 = vmatpush3.bf16.msra.mxu0 %v2446_v21 }
 0x237   : > { %2268 = vmatprep.subr.bf16.mxu0 %v2519_v0 }
 0x2f8   : > { %v901_v23 = vpop.f32.mrb[16].mxu0  ;;  %v1037_v24 = vpop.f32.mrb[16].mxu1 }
 0x2f9   : > { %1993 = vst.msk [vmem:[%s2720_s19 + $0x20] sm:$0xff] %vm489_vm2, %v901_v23  ;;  %2001 = vst.msk [vmem:[%s2720_s19 + $0x28] sm:$0xff] %vm489_vm2, %v1037_v24  ;;  %v2206_v25 = vpop.f32.mrb[17].mxu0  ;;  %v2224_v26 = vpop.f32.mrb[17].mxu1 }
 0x2fa   : > { %v904_v27 = vpop.f32.mrb[18].mxu0  ;;  %v1040_v28 = vpop.f32.mrb[18].mxu1 }
 0x2fb   : > { %1994 = vst.msk [vmem:[%s2720_s19 + $0x30] sm:$0xff] %vm489_vm2, %v904_v27  ;;  %2002 = vst.msk [vmem:[%s2720_s19 + $0x38] sm:$0xff] %vm489_vm2, %v1040_v28  ;;  %v2207_v29 = vpop.f32.mrb[19].mxu0  ;;  %v2225_v30 = vpop.f32.mrb[19].mxu1 }
 0x300   : > { %v1138_v31 = vpop.f32.mrb[20].mxu1  ;;  %v1096_v32 = vpop.f32.mrb[20].mxu0 }
 0x301   : > { %v2236_v33 = vpop.f32.mrb[21].mxu1  ;;  %v2230_v34 = vpop.f32.mrb[21].mxu0 }
 0x302   : > { %v1141_v35 = vpop.f32.mrb[22].mxu1  ;;  %v1099_v36 = vpop.f32.mrb[22].mxu0 }
 0x303   : > { %v1145_v37 = vpack.c.bf16 %v1141_v35, %v1138_v31  ;;  %v2237_v38 = vpop.f32.mrb[23].mxu1  ;;  %v1103_v39 = vpack.c.bf16 %v1099_v36, %v1096_v32  ;;  %v2231_v40 = vpop.f32.mrb[23].mxu0 }
 0x305   : > { %2247 = vmatmul.mubr.msk.bf16.vlgmr.msra.gmra.mrb[24].mxu1 %vm217_vm1, %v1145_v37  ;;  %2265 = vmatmul.mubr.msk.bf16.vlgmr.msra.gmra.mrb[28].mxu0 %vm217_vm1, %v1145_v37 }
 0x306   : > { %2269 = vmatpush3.bf16.msra.mxu0 %v2446_v21  ;;  %2251 = vmatpush3.bf16.msra.mxu1 %v2447_v22 }
 0x307   : > { %2252 = vmatprep.mubr.msk.bf16.mxu1 %vm2520_vm0, %v2519_v0  ;;  %2270 = vmatprep.mubr.msk.bf16.mxu0 %vm2520_vm0, %v2519_v0 }
 0x308   : > { %2274 = vmatprep.subr.bf16.mxu0 %v2519_v0  ;;  %v1180_v41 = vpop.f32.mrb[24].mxu0  ;;  %2256 = vmatprep.subr.bf16.mxu1 %v2519_v0 }
 0x309   : > { %v2242_v42 = vpop.f32.mrb[25].mxu0 }
 0x30a   : > { %v1183_v45 = vpop.f32.mrb[26].mxu0 }
 0x30b   : > { %v1187_v46 = vpack.c.bf16 %v1183_v45, %v1180_v41  ;;  %v2243_v47 = vpop.f32.mrb[27].mxu0 }
 0x311   : > { %2253 = vmatmul.mubr.msk.bf16.vlgmr.msra.gmra.mrb[24].mxu1 %vm217_vm1, %v1103_v39  ;;  %2271 = vmatmul.mubr.msk.bf16.vlgmr.msra.gmra.mrb[28].mxu0 %vm217_vm1, %v1103_v39 }
 0x312   : > { %2275 = vmatpush3.bf16.msra.mxu0 %v2446_v21  ;;  %2257 = vmatpush3.bf16.msra.mxu1 %v2447_v22 }
 0x313   : > { %2258 = vmatprep.mubr.msk.bf16.mxu1 %vm2520_vm0, %v2519_v0  ;;  %2276 = vmatprep.mubr.msk.bf16.mxu0 %vm2520_vm0, %v2519_v0 }
 0x314   : > { %2286 = vmatprep.subr.bf16.mxu0 %v2519_v0  ;;  %2280 = vmatprep.subr.bf16.mxu1 %v2519_v0 }
 0x31d   : > { %2259 = vmatmul.mubr.msk.bf16.vlgmr.msra.gmra.mrb[24].mxu1 %vm217_vm1, %v1187_v46  ;;  %2277 = vmatmul.mubr.msk.bf16.vlgmr.msra.gmra.mrb[28].mxu0 %vm217_vm1, %v1187_v46 }
 0x31e   : > { %2287 = vmatpush3.bf16.msra.mxu0 %v1476_v53  ;;  %2288 = vmatprep.mubr.msk.bf16.mxu0 %vm2520_vm0, %v2519_v0 }
 0x31f   : > { %2281 = vmatpush3.bf16.msra.mxu1 %v1471_v48  ;;  %2282 = vmatprep.mubr.msk.bf16.mxu1 %vm2520_vm0, %v2519_v0 }
 0x320   : > { %2292 = vmatprep.subr.bf16.mxu1 %v2519_v0  ;;  %2298 = vmatprep.subr.bf16.mxu0 %v2519_v0 }
 0x325   : > { %2289 = vmatmul.mubr.msk.bf16.vlgmr.msra.gmra.mrb[32].mxu0 %vm217_vm1, %v2643_v4  ;;  %2283 = vmatmul.mubr.msk.bf16.vlgmr.msra.gmra.mrb[28].mxu1 %vm217_vm1, %v2643_v4 }
 0x326   : > { %2293 = vmatpush3.bf16.msra.mxu1 %v1481_v58  ;;  %2294 = vmatprep.mubr.msk.bf16.mxu1 %vm2520_vm0, %v2519_v0 }
 0x327   : > { %2316 = vmatprep.subr.bf16.mxu1 %v2519_v0  ;;  %2300 = vmatprep.mubr.msk.bf16.mxu0 %vm2520_vm0, %v2519_v0 }
 0x328   : > { %2299 = vmatpush3.bf16.msra.mxu0 %v2448_v59 }
 0x329   : > { %2304 = vmatprep.subr.bf16.mxu0 %v2519_v0 }
 0x32d   : > { %2295 = vmatmul.mubr.msk.bf16.vlgmr.msra.gmra.mrb[32].mxu1 %vm217_vm1, %v2643_v4 }
 0x32e   : > { %2318 = vmatprep.mubr.msk.bf16.mxu1 %vm2520_vm0, %v2519_v0  ;;  %2317 = vmatpush3.bf16.msra.mxu1 %v2449_v60 }
 0x32f   : > { %2322 = vmatprep.subr.bf16.mxu1 %v2519_v0 }
 0x3f0   : > { %v1321_v4 = vpop.f32.mrb[24].mxu1  ;;  %v1457_v61 = vpop.f32.mrb[28].mxu0 }
 0x3f1   : > { %2012 = vst.msk [vmem:[%s2720_s19 + $0x40] sm:$0xff] %vm489_vm2, %v1321_v4  ;;  %2020 = vst.msk [vmem:[%s2720_s19 + $0x48] sm:$0xff] %vm489_vm2, %v1457_v61  ;;  %v2260_v62 = vpop.f32.mrb[25].mxu1  ;;  %v2278_v63 = vpop.f32.mrb[29].mxu0 }
 0x3f2   : > { %v1324_v1 = vpop.f32.mrb[26].mxu1  ;;  %v1460_v2 = vpop.f32.mrb[30].mxu0 }
 0x3f3   : > { %2013 = vst.msk [vmem:[%s2720_s19 + $0x50] sm:$0xff] %vm489_vm2, %v1324_v1  ;;  %2021 = vst.msk [vmem:[%s2720_s19 + $0x58] sm:$0xff] %vm489_vm2, %v1460_v2  ;;  %v2261_v3 = vpop.f32.mrb[27].mxu1  ;;  %v2279_v5 = vpop.f32.mrb[31].mxu0 }
 0x3f8   : > { %v1558_v6 = vpop.f32.mrb[32].mxu0  ;;  %v1516_v7 = vpop.f32.mrb[28].mxu1 }
 0x3f9   : > { %v2290_v8 = vpop.f32.mrb[33].mxu0  ;;  %v2284_v9 = vpop.f32.mrb[29].mxu1 }
 0x3fa   : > { %v1561_v10 = vpop.f32.mrb[34].mxu0  ;;  %v1519_v11 = vpop.f32.mrb[30].mxu1 }
 0x3fb   : > { %v1565_v12 = vpack.c.bf16 %v1561_v10, %v1558_v6  ;;  %v2291_v13 = vpop.f32.mrb[35].mxu0  ;;  %v1523_v14 = vpack.c.bf16 %v1519_v11, %v1516_v7  ;;  %v2285_v15 = vpop.f32.mrb[31].mxu1 }
 0x3fd   : > { %2301 = vmatmul.mubr.msk.bf16.vlgmr.msra.gmra.mrb[36].mxu0 %vm217_vm1, %v1565_v12  ;;  %2319 = vmatmul.mubr.msk.bf16.vlgmr.msra.gmra.mrb[36].mxu1 %vm217_vm1, %v1565_v12 }
 0x3fe   : > { %2305 = vmatpush3.bf16.msra.mxu0 %v2448_v59  ;;  %2323 = vmatpush3.bf16.msra.mxu1 %v2449_v60 }
 0x3ff   : > { %2306 = vmatprep.mubr.msk.bf16.mxu0 %vm2520_vm0, %v2519_v0  ;;  %2310 = vmatprep.subr.bf16.mxu0 %v2519_v0 }
 0x400   : > { %2324 = vmatprep.mubr.msk.bf16.mxu1 %vm2520_vm0, %v2519_v0  ;;  %2328 = vmatprep.subr.bf16.mxu1 %v2519_v0  ;;  %v1600_v16 = vpop.f32.mrb[32].mxu1 }
 0x401   : > { %v2296_v17 = vpop.f32.mrb[33].mxu1 }
 0x402   : > { %v1603_v18 = vpop.f32.mrb[34].mxu1 }
 0x403   : > { %v1607_v19 = vpack.c.bf16 %v1603_v18, %v1600_v16  ;;  %v2297_v20 = vpop.f32.mrb[35].mxu1 }
 0x409   : > { %2307 = vmatmul.mubr.msk.bf16.vlgmr.msra.gmra.mrb[36].mxu0 %vm217_vm1, %v1523_v14  ;;  %2325 = vmatmul.mubr.msk.bf16.vlgmr.msra.gmra.mrb[36].mxu1 %vm217_vm1, %v1523_v14 }
 0x40a   : > { %2311 = vmatpush3.bf16.msra.mxu0 %v2448_v59  ;;  %2329 = vmatpush3.bf16.msra.mxu1 %v2449_v60 }
 0x40b   : > { %2312 = vmatprep.mubr.msk.bf16.mxu0 %vm2520_vm0, %v2519_v0  ;;  %2330 = vmatprep.mubr.msk.bf16.mxu1 %vm2520_vm0, %v2519_v0 }
 0x415   : > { %2313 = vmatmul.mubr.msk.bf16.vlgmr.msra.gmra.mrb[36].mxu0 %vm217_vm1, %v1607_v19  ;;  %2331 = vmatmul.mubr.msk.bf16.vlgmr.msra.gmra.mrb[36].mxu1 %vm217_vm1, %v1607_v19 }
 0x4e8   : > { %v1741_v21 = vpop.f32.mrb[36].mxu0  ;;  %v1877_v22 = vpop.f32.mrb[36].mxu1 }
 0x4e9   : > { %2031 = vst.msk [vmem:[%s2720_s19 + $0x60] sm:$0xff] %vm489_vm2, %v1741_v21  ;;  %2039 = vst.msk [vmem:[%s2720_s19 + $0x68] sm:$0xff] %vm489_vm2, %v1877_v22  ;;  %v2314_v23 = vpop.f32.mrb[37].mxu0  ;;  %v2332_v24 = vpop.f32.mrb[37].mxu1 }
 0x4ea   : > { %v1744_v25 = vpop.f32.mrb[38].mxu0  ;;  %v1880_v26 = vpop.f32.mrb[38].mxu1 }
 0x4eb   : > { %2032 = vst.msk [vmem:[%s2720_s19 + $0x70] sm:$0xff] %vm489_vm2, %v1744_v25  ;;  %2040 = vst.msk [vmem:[%s2720_s19 + $0x78] sm:$0xff] %vm489_vm2, %v1880_v26  ;;  %v2315_v27 = vpop.f32.mrb[39].mxu0  ;;  %v2333_v0 = vpop.f32.mrb[39].mxu1 }
 0x4ec PF: > { %p13_p8 = scmp.ge.s32.totalorder %s2561_s17, 4   ;;  %s2884_s12 = smov %s2506_s13 }
 0x4ed   : > { %s2885_s13 = smov %s2510_s14  ;;  %s2886_s14 = smov %s2571_s20 }
 0x4ee   : > { %s2887_s15 = smov %s2561_s17  ;;  %15 = sbr.rel (!%p13_p8) target bundleno = 3 (0x3), region = 79 }
 0x4f5   :  { %1912 = vsyncpa [#allocation3], 1 }
 0x4f6   :  { %1914 = vsyncpa [#allocation3 + $0x1], 1 }

</bundles_post_ra>
